<compile_context>
chip_gen: v7x
topology: tpu7x:2x2x1
jax: 0.10.0
libtpu: 0.0.40
codegen_flags: <defaults>
</compile_context>

<pallas_src>
import random

import jax
import jax.numpy as jnp
from jax import lax
from jax.experimental import pallas as pl
from jax.experimental.pallas import tpu as pltpu

# Below this many rows, a plain lax.dynamic_slice beats a pallas_call launch.
_PALLAS_MIN_ROWS = 16
_ROW_BUCKET = 8  # f32 sublane alignment; also caps per-length recompiles.


def _pos_emb_kernel(start_ref, emb_hbm, out_hbm, sem):
    # start_ref: SMEM scalar-prefetch ref, shape (1,), int32
    # emb_hbm:   HBM ref (memory_space=pl.ANY), (seq_len, model_dim)
    # out_hbm:   HBM ref (memory_space=pl.ANY), (sl_pad, model_dim)
    # sem:       DMA completion semaphore
    sl = out_hbm.shape[0]
    seq_len = emb_hbm.shape[0]
    # Clamp: HBM refs have no runtime bounds check; keep the window in-bounds
    # even if `start` ever arrives as a traced/device value.
    start = jnp.clip(start_ref[0], 0, seq_len - sl)
    cp = pltpu.make_async_copy(emb_hbm.at[pl.ds(start, sl), :], out_hbm, sem)
    cp.start()
    cp.wait()


class LearnedPositionEmbeddings:
    """JAX/Pallas port of the PyTorch module."""

    def __init__(self, seq_len, model_dim, init=0.02, relative=False, key=None):
        if key is None:
            key = jax.random.PRNGKey(0)
        # nn.Embedding(seq_len, model_dim).weight.data.normal_(0.0, init)
        self.weight = init * jax.random.normal(
            key, (seq_len, model_dim), dtype=jnp.float32
        )
        self.seq_len = seq_len
        self.model_dim = model_dim
        self.relative = relative
        self._calls = {}  # padded sl -> jit-wrapped pallas_call
        self._zero_start = jnp.zeros((1,), dtype=jnp.int32)  # cached device scalar

    # ---- Pallas path (HBM -> HBM window copy) -------------------------------
    def _get_call(self, sl_pad):
        fn = self._calls.get(sl_pad)
        if fn is None:
            grid_spec = pltpu.PrefetchScalarGridSpec(
                num_scalar_prefetch=1,
                grid=(1,),
                # Table stays in HBM; output is HBM too -> single HBM->HBM DMA,
                # no VMEM staging / writeback.
                in_specs=[pl.BlockSpec(memory_space=pl.ANY)],
                out_specs=pl.BlockSpec(memory_space=pl.ANY),
                scratch_shapes=[pltpu.SemaphoreType.DMA(())],
            )
            fn = jax.jit(
                pl.pallas_call(
                    _pos_emb_kernel,
                    out_shape=jax.ShapeDtypeStruct(
                        (sl_pad, self.model_dim), jnp.float32
                    ),
                    grid_spec=grid_spec,
                    cost_estimate=pl.CostEstimate(
                        flops=0,
                        transcendentals=0,
                        bytes_accessed=2 * sl_pad * self.model_dim * 4,
                    ),
                    compiler_params=pltpu.CompilerParams(
                        dimension_semantics=("arbitrary",)
                    ),
                )
            )
            self._calls[sl_pad] = fn
        return fn

    # ---- dispatch ------------------------------------------------------------
    def _lookup(self, start, sl):
        assert 0 < sl <= self.seq_len, (sl, self.seq_len)
        assert 0 <= start and start + sl <= self.seq_len, (start, sl, self.seq_len)

        # Tiny windows: launch overhead dwarfs the copy; let XLA do it.
        if sl < _PALLAS_MIN_ROWS:
            return lax.dynamic_slice(self.weight, (start, 0), (sl, self.model_dim))

        # Bucket sl up to a sublane-aligned size so distinct lengths share a
        # compiled kernel; shift the window down if padding would run off the
        # end of the table, then slice the requested rows back out.
        sl_pad = min(-(-sl // _ROW_BUCKET) * _ROW_BUCKET, self.seq_len)
        start_pad = min(start, self.seq_len - sl_pad)
        offset = start - start_pad  # static Python int

        if start_pad == 0:
            start_arr = self._zero_start  # no per-call host->device transfer
        else:
            start_arr = jnp.asarray([start_pad], dtype=jnp.int32)

        out = self._get_call(sl_pad)(start_arr, self.weight)
        if sl_pad == sl and offset == 0:
            return out
        return out[offset : offset + sl]

    # ---- public API ----------------------------------------------------------
    def forward(self, x):
        sl = x.shape[1]
        assert sl <= self.seq_len, (sl, self.seq_len)
        if self.relative:
            # Host-side Python RNG, matching the PyTorch module's `random` use.
            # TODO(synk): if forward() is ever jit-wrapped, switch to on-device
            # jax.random and feed `start` as a traced scalar (in-kernel clamp
            # already keeps the DMA window safe).
            start = random.randint(sl, self.seq_len) - sl
        else:
            start = 0
        return self._lookup(start, sl)

    def get_fixed_embedding(self, ind, dev=None):
        # emb(tensor([ind])).unsqueeze(0) -> shape (1, 1, model_dim)
        ind = int(ind)
        assert 0 <= ind < self.seq_len, (ind, self.seq_len)
        row = lax.dynamic_slice(self.weight, (ind, 0), (1, self.model_dim))
        return row[None, :, :]

    __call__ = forward


if __name__ == "__main__":
    # Small shapes; model_dim multiple of 128 keeps the table lane-dense.
    seq_len, model_dim = 64, 128
    batch = 2

    key = jax.random.PRNGKey(0)
    k_emb, k_x = jax.random.split(key)

    module = LearnedPositionEmbeddings(
        seq_len, model_dim, init=0.02, relative=False, key=k_emb
    )

    # --- Pallas HBM->HBM path (sl >= threshold, multiple of 8) ---
    sl = 32
    x = jax.random.normal(k_x, (batch, sl, model_dim), dtype=jnp.float32)
    out = jax.block_until_ready(module(x))
    assert out.shape == (sl, model_dim), out.shape
    assert out.dtype == jnp.float32
    assert jnp.allclose(out, module.weight[:sl, :]), "mismatch vs reference slice"

    # Second call with the same sl reuses the cached compiled call.
    out2 = jax.block_until_ready(module(x))
    assert jnp.allclose(out2, module.weight[:sl, :])

    # --- Pallas path with sl bucketing (sl=20 -> padded window, sliced back) ---
    sl2 = 20
    x2 = jax.random.normal(k_x, (batch, sl2, model_dim), dtype=jnp.float32)
    out3 = jax.block_until_ready(module(x2))
    assert out3.shape == (sl2, model_dim)
    assert jnp.allclose(out3, module.weight[:sl2, :])

    # --- Tiny-window bypass (no Pallas launch) ---
    sl3 = 4
    x3 = jax.random.normal(k_x, (batch, sl3, model_dim), dtype=jnp.float32)
    out4 = jax.block_until_ready(module(x3))
    assert jnp.allclose(out4, module.weight[:sl3, :])

    # get_fixed_embedding (single row, bypass path).
    fixed = jax.block_until_ready(module.get_fixed_embedding(3))
    assert fixed.shape == (1, 1, model_dim)
    assert jnp.allclose(fixed[0, 0], module.weight[3])

    # --- Relative path: output must equal SOME contiguous sl-row window ---
    module_rel = LearnedPositionEmbeddings(
        seq_len, model_dim, init=0.02, relative=True, key=k_emb
    )
    out_rel = jax.block_until_ready(module_rel(x))
    assert out_rel.shape == (sl, model_dim)
    ok = any(
        bool(jnp.allclose(out_rel, module_rel.weight[s : s + sl, :]))
        for s in range(seq_len - sl + 1)
    )
    assert ok, "relative output is not a contiguous window of the table"

    # Relative + bucketing (sl not a multiple of 8).
    out_rel2 = jax.block_until_ready(module_rel(x2))
    assert out_rel2.shape == (sl2, model_dim)
    ok2 = any(
        bool(jnp.allclose(out_rel2, module_rel.weight[s : s + sl2, :]))
        for s in range(seq_len - sl2 + 1)
    )
    assert ok2, "relative (padded) output is not a contiguous window of the table"

    print("KERNEL_OK")
</pallas_src>

<mosaic_0001>
module attributes {stable_mosaic.version = 11 : i64} {
  func.func @_pos_emb_kernel(%arg0: i32, %arg1: memref<1xi32, #tpu.memory_space<smem>>, %arg2: memref<64x128xf32, #tpu.memory_space<any>>, %arg3: memref<32x128xf32, #tpu.memory_space<any>>, %arg4: memref<!tpu.dma_semaphore, #tpu.memory_space<semaphore_mem>>) attributes {dimension_semantics = [#tpu.dimension_semantics<arbitrary>], iteration_bounds = array<i64: 1>, scalar_prefetch = 1 : i64, scratch_operands = 1 : i64, tpu.core_type = #tpu.core_type<tc>, window_params = [{}, {}]} {
    %c0 = arith.constant 0 : index
    %0 = memref.load %arg1[%c0] : memref<1xi32, #tpu.memory_space<smem>>
    %c0_i32 = arith.constant 0 : i32
    %c32_i32 = arith.constant 32 : i32
    %1 = arith.maxsi %c0_i32, %0 : i32
    %2 = arith.minsi %c32_i32, %1 : i32
    %c0_i32_0 = arith.constant 0 : i32
    %3 = tpu.memref_slice %arg2[%2, %c0_i32_0] : memref<64x128xf32, #tpu.memory_space<any>> -> memref<32x128xf32, #tpu.memory_space<any>>
    tpu.enqueue_dma source(%3 : memref<32x128xf32, #tpu.memory_space<any>>) target(%arg3 : memref<32x128xf32, #tpu.memory_space<any>>) target_semaphore(%arg4 : memref<!tpu.dma_semaphore, #tpu.memory_space<semaphore_mem>>)
    %c0_i32_1 = arith.constant 0 : i32
    %4 = tpu.memref_slice %arg2[%2, %c0_i32_1] : memref<64x128xf32, #tpu.memory_space<any>> -> memref<32x128xf32, #tpu.memory_space<any>>
    tpu.wait_dma2 semaphore(%arg4 : memref<!tpu.dma_semaphore, #tpu.memory_space<semaphore_mem>>) src(%4 : memref<32x128xf32, #tpu.memory_space<any>>) dst(%arg3 : memref<32x128xf32, #tpu.memory_space<any>>)
    return
  }
}

</mosaic_0001>

<bundles_post_ra>
// kernel: tpu_custom_call.1
= control target key start
LH: loop header
LB: loop body
LE: loop exit
PB: predicated region body
PF: predicated region fallthrough
CT: control target
= control target key end

     0   :  { %s53_s19 = smov [#allocation2]   ;;  %s54_s20 = smov [#allocation5]   ;;  %s86_s0 = inlined_call_operand.<no memory space> [shape: s32[1], index: 0, kind: input, shape index: {}]   ;;  %s87_s1 = inlined_call_operand.hbm [shape: f32[64,128], index: 1, kind: input, shape index: {}]   ;;  %s88_s2 = inlined_call_operand.hbm [shape: f32[32,128], index: 2, kind: output, shape index: {}]  }
   0x1   :  { %p9_p0 = scmp.gt.s32.totalorder %s86_s0, 0  ;;  %p39_p1 = scmp.lt.s32.totalorder %s86_s0, 32 }
   0x2   :  { %s55_s21 = smov 0  }
   0x3   :  { %s90_s0 = smov (!%p9_p0, %s86_s0), 0 }
   0x4   :  { %s92_s0 = smov (!%p39_p1, %s90_s0), 32 }
   0x5   :  { %s44_s15 = sshll.u32 %s92_s0, 4 }
   0x6   :  { %s14_s18 = scalar_lea.hbm %s87_s1, %s44_s15 }
   0x7   :  { %27 = dma.general %s14_s18, 512, %s88_s2, %s53_s19, %s54_s20, [#allocation6], %s55_s21, 0  }
   0x8   :  { %51 = dma.done.wait [#allocation2], 512 }
   0x9   :  { %52 = vsyncadd [#allocation2], 4294966784 }
   0xa   :  { %31 = vsyncmov [#allocation2] }
   0xd   :  { %s32_s24 = vpop.sfrf %31 }
   0xe   :  { %p45_p2 = scmp.ne.s32.totalorder %s32_s24, 0 }
  0x10   :  { %36 = shalt.err (%p45_p2)  }

</bundles_post_ra>
